<compile_context>
chip_gen: v6e
topology: v6e:2x2x1
jax: 0.10.0
libtpu: 0.0.40
codegen_flags: <defaults>
</compile_context>

<pallas_src>
import functools

import jax
import jax.numpy as jnp
from jax import lax
from jax.experimental import pallas as pl
from jax.experimental.pallas import tpu as pltpu

LANES = 128
MAX_TILE_ROWS = 2048   # (2048,128) f32 block = 1 MiB per stream


def _sublane_multiple(dtype):
    itemsize = jnp.dtype(dtype).itemsize
    return max(8, 32 // max(1, min(itemsize, 4)))   # f32->8, bf16->16, i8->32


def _dice_kernel(x_ref, t_ref, out_ref, *, last_rows, needs_mask):
    i = pl.program_id(0)
    steps = pl.num_programs(0)
    tile_rows = x_ref.shape[0]

    @pl.when(i == 0)
    def _init():
        out_ref[...] = jnp.zeros_like(out_ref)

    x = x_ref[...].astype(jnp.float32)   # native-dtype DMA, in-kernel cast
    t = t_ref[...].astype(jnp.float32)
    # sigmoid(x) == 0.5 * tanh(0.5 * x) + 0.5  -- keeps the transcendental on EUP.
    p = 0.5 * jnp.tanh(0.5 * x) + 0.5
    num = p * t        # intersection contribution
    den = p + t        # p.sum() + t.sum() contribution (merged accumulator)

    def _accumulate(nv, dv):
        # Reduce the tile to one (8,128) slab (pure vreg-wise VPU adds, no
        # cross-lane work) and RMW the resident output accumulator once per step.
        out_ref[0] += jnp.sum(nv.reshape(tile_rows // 8, 8, LANES), axis=0)
        out_ref[1] += jnp.sum(dv.reshape(tile_rows // 8, 8, LANES), axis=0)

    if needs_mask:
        # Row count is not a multiple of the tile: the final block carries
        # Pallas' undefined partial-block padding, which must be zeroed.
        # The mask runs only in that single grid step.
        @pl.when(i < steps - 1)
        def _bulk():
            _accumulate(num, den)

        @pl.when(i == steps - 1)
        def _tail():
            row = lax.broadcasted_iota(jnp.int32, (tile_rows, LANES), 0)
            keep = row < last_rows
            _accumulate(jnp.where(keep, num, 0.0), jnp.where(keep, den, 0.0))
    else:
        _accumulate(num, den)


def dice_loss(inputs, targets, smooth=1.0):
    """Pallas DiceLoss forward; `inputs` are pre-activation logits (any shape).

    Sigmoid is applied inside the kernel; inputs/targets stream in native dtype.
    `smooth` must be a static Python scalar.
    """
    x = inputs.reshape(-1)
    t = targets.reshape(-1)
    n = x.shape[0]

    row_mult = max(_sublane_multiple(x.dtype), _sublane_multiple(t.dtype))
    rows = max(row_mult, pl.cdiv(n, LANES))
    n_arr = rows * LANES
    pad_tail = n_arr - n                       # zero-padded logits/targets
    if pad_tail:
        # Minimal pad to a lane multiple; the sigmoid(0)=0.5 leak into the
        # denominator is corrected analytically below (no in-kernel mask).
        x = jnp.pad(x, (0, pad_tail))
        t = jnp.pad(t, (0, pad_tail))
    x2 = x.reshape(rows, LANES)
    t2 = t.reshape(rows, LANES)

    tile_rows = min(MAX_TILE_ROWS, (rows // row_mult) * row_mult)
    steps = pl.cdiv(rows, tile_rows)
    last_rows = rows - (steps - 1) * tile_rows   # valid rows in the final block
    needs_mask = last_rows != tile_rows

    blk_in = pl.BlockSpec((tile_rows, LANES), lambda i: (i, 0))
    blk_out = pl.BlockSpec((2, 8, LANES), lambda i: (0, 0, 0))

    cost = pl.CostEstimate(
        flops=8 * rows * LANES,
        transcendentals=rows * LANES,
        bytes_accessed=int(x2.size) * x2.dtype.itemsize
        + int(t2.size) * t2.dtype.itemsize
        + 2 * 8 * LANES * 4,
    )

    sums = pl.pallas_call(
        functools.partial(_dice_kernel, last_rows=last_rows,
                          needs_mask=needs_mask),
        out_shape=jax.ShapeDtypeStruct((2, 8, LANES), jnp.float32),
        grid_spec=pltpu.PrefetchScalarGridSpec(
            num_scalar_prefetch=0,
            grid=(steps,),
            in_specs=[blk_in, blk_in],
            out_specs=blk_out,
        ),
        compiler_params=pltpu.CompilerParams(
            dimension_semantics=("arbitrary",)),
        cost_estimate=cost,
    )(x2, t2)

    s_num = jnp.sum(sums[0])
    s_den = jnp.sum(sums[1]) - 0.5 * pad_tail   # remove sigmoid(0) pad leak
    dice = (2.0 * s_num + float(smooth)) / (s_den + float(smooth))
    return 1.0 - dice


def dice_loss_ref(inputs, targets, smooth=1.0):
    p = jax.nn.sigmoid(inputs.astype(jnp.float32)).reshape(-1)
    t = targets.astype(jnp.float32).reshape(-1)
    inter = jnp.sum(p * t)
    dice = (2.0 * inter + smooth) / (jnp.sum(p) + jnp.sum(t) + smooth)
    return 1.0 - dice


if __name__ == "__main__":
    key = jax.random.PRNGKey(0)
    k1, k2, k3, k4 = jax.random.split(key, 4)

    # NCHW logits and binary targets (lane-aligned small case -> no pad copy).
    x = jax.random.normal(k1, (2, 4, 16, 16), dtype=jnp.float32)
    tgt = (jax.random.uniform(k2, (2, 4, 16, 16)) > 0.5).astype(jnp.float32)
    loss = jax.block_until_ready(dice_loss(x, tgt, smooth=1.0))
    ref = jax.block_until_ready(dice_loss_ref(x, tgt, smooth=1.0))
    assert jnp.allclose(loss, ref, rtol=1e-5, atol=1e-5), (loss, ref)

    # Ragged case (exercises the minimal lane pad + analytic 0.5*pad correction).
    x2 = jax.random.normal(k3, (3, 1, 13, 17), dtype=jnp.float32)
    tgt2 = (jax.random.uniform(k4, (3, 1, 13, 17)) > 0.5).astype(jnp.float32)
    loss2 = jax.block_until_ready(dice_loss(x2, tgt2, smooth=1.0))
    ref2 = jax.block_until_ready(dice_loss_ref(x2, tgt2, smooth=1.0))
    assert jnp.allclose(loss2, ref2, rtol=1e-5, atol=1e-5), (loss2, ref2)

    print("KERNEL_OK")
</pallas_src>

<mosaic_0001>
module attributes {stable_mosaic.version = 11 : i64} {
  func.func @_dice_kernel(%arg0: i32, %arg1: memref<16x128xf32, #tpu.memory_space<vmem>>, %arg2: memref<16x128xf32, #tpu.memory_space<vmem>>, %arg3: memref<2x8x128xf32, #tpu.memory_space<vmem>>) attributes {dimension_semantics = [#tpu.dimension_semantics<arbitrary>], iteration_bounds = array<i64: 1>, scalar_prefetch = 0 : i64, scratch_operands = 0 : i64, tpu.core_type = #tpu.core_type<tc>, window_params = [{transform_indices = @transform_0, window_bounds = array<i64: 16, 128>}, {transform_indices = @transform_1, window_bounds = array<i64: 16, 128>}, {pipeline_mode = #tpu.pipeline_mode<synchronous>, transform_indices = @transform_2, window_bounds = array<i64: 2, 8, 128>}]} {
    %c0_i32 = arith.constant 0 : i32
    %0 = arith.cmpi eq, %arg0, %c0_i32 : i32
    %1 = arith.extui %0 : i1 to i32
    %c0_i32_0 = arith.constant 0 : i32
    %2 = arith.cmpi ne, %1, %c0_i32_0 : i32
    scf.if %2 {
      %cst_19 = arith.constant 0.000000e+00 : f32
      %30 = vector.broadcast %cst_19 : f32 to vector<2x8x128xf32>
      %c0_20 = arith.constant 0 : index
      %c0_21 = arith.constant 0 : index
      %c0_22 = arith.constant 0 : index
      %31 = vector.load %arg3[%c0_20, %c0_21, %c0_22] : memref<2x8x128xf32, #tpu.memory_space<vmem>>, vector<2x8x128xf32>
      tpu.vector_store %arg3[%c0_20, %c0_21, %c0_22], %30 {strides = array<i32>} : memref<2x8x128xf32, #tpu.memory_space<vmem>>, vector<2x8x128xf32>,
    } else {
    }
    %c0 = arith.constant 0 : index
    %c0_1 = arith.constant 0 : index
    %3 = vector.load %arg1[%c0, %c0_1] : memref<16x128xf32, #tpu.memory_space<vmem>>, vector<16x128xf32>
    %c0_2 = arith.constant 0 : index
    %c0_3 = arith.constant 0 : index
    %4 = vector.load %arg2[%c0_2, %c0_3] : memref<16x128xf32, #tpu.memory_space<vmem>>, vector<16x128xf32>
    %cst = arith.constant 5.000000e-01 : f32
    %5 = vector.broadcast %cst : f32 to vector<16x128xf32>
    %6 = arith.mulf %5, %3 : vector<16x128xf32>
    %7 = math.tanh %6 : vector<16x128xf32>
    %cst_4 = arith.constant 5.000000e-01 : f32
    %8 = vector.broadcast %cst_4 : f32 to vector<16x128xf32>
    %9 = arith.mulf %8, %7 : vector<16x128xf32>
    %cst_5 = arith.constant 5.000000e-01 : f32
    %10 = vector.broadcast %cst_5 : f32 to vector<16x128xf32>
    %11 = arith.addf %9, %10 : vector<16x128xf32>
    %12 = arith.mulf %11, %4 : vector<16x128xf32>
    %13 = arith.addf %11, %4 : vector<16x128xf32>
    %c0_6 = arith.constant 0 : index
    %c0_7 = arith.constant 0 : index
    %c0_8 = arith.constant 0 : index
    %14 = vector.load %arg3[%c0_6, %c0_7, %c0_8] : memref<2x8x128xf32, #tpu.memory_space<vmem>>, vector<1x8x128xf32>
    %15 = vector.shape_cast %14 : vector<1x8x128xf32> to vector<8x128xf32>
    %16 = vector.shape_cast %12 : vector<16x128xf32> to vector<2x8x128xf32>
    %cst_9 = arith.constant dense<0.000000e+00> : vector<8x128xf32>
    %17 = vector.multi_reduction <add>, %16, %cst_9 [0] : vector<2x8x128xf32> to vector<8x128xf32>
    %18 = arith.addf %15, %17 : vector<8x128xf32>
    %c0_10 = arith.constant 0 : index
    %c0_11 = arith.constant 0 : index
    %c0_12 = arith.constant 0 : index
    %19 = vector.load %arg3[%c0_10, %c0_11, %c0_12] : memref<2x8x128xf32, #tpu.memory_space<vmem>>, vector<1x8x128xf32>
    %20 = vector.shape_cast %19 : vector<1x8x128xf32> to vector<8x128xf32>
    %21 = vector.shape_cast %18 : vector<8x128xf32> to vector<1x8x128xf32>
    tpu.vector_store %arg3[%c0_10, %c0_11, %c0_12], %21 {strides = array<i32>} : memref<2x8x128xf32, #tpu.memory_space<vmem>>, vector<1x8x128xf32>,
    %c1 = arith.constant 1 : index
    %c0_13 = arith.constant 0 : index
    %c0_14 = arith.constant 0 : index
    %22 = vector.load %arg3[%c1, %c0_13, %c0_14] : memref<2x8x128xf32, #tpu.memory_space<vmem>>, vector<1x8x128xf32>
    %23 = vector.shape_cast %22 : vector<1x8x128xf32> to vector<8x128xf32>
    %24 = vector.shape_cast %13 : vector<16x128xf32> to vector<2x8x128xf32>
    %cst_15 = arith.constant dense<0.000000e+00> : vector<8x128xf32>
    %25 = vector.multi_reduction <add>, %24, %cst_15 [0] : vector<2x8x128xf32> to vector<8x128xf32>
    %26 = arith.addf %23, %25 : vector<8x128xf32>
    %c1_16 = arith.constant 1 : index
    %c0_17 = arith.constant 0 : index
    %c0_18 = arith.constant 0 : index
    %27 = vector.load %arg3[%c1_16, %c0_17, %c0_18] : memref<2x8x128xf32, #tpu.memory_space<vmem>>, vector<1x8x128xf32>
    %28 = vector.shape_cast %27 : vector<1x8x128xf32> to vector<8x128xf32>
    %29 = vector.shape_cast %26 : vector<8x128xf32> to vector<1x8x128xf32>
    tpu.vector_store %arg3[%c1_16, %c0_17, %c0_18], %29 {strides = array<i32>} : memref<2x8x128xf32, #tpu.memory_space<vmem>>, vector<1x8x128xf32>,
    return
  }
  func.func @transform_0(%arg0: i32) -> (i32, i32) {
    %c0_i32 = arith.constant 0 : i32
    %c0_i32_0 = arith.constant 0 : i32
    return %arg0, %c0_i32 : i32, i32
  }
  func.func @transform_1(%arg0: i32) -> (i32, i32) {
    %c0_i32 = arith.constant 0 : i32
    %c0_i32_0 = arith.constant 0 : i32
    return %arg0, %c0_i32 : i32, i32
  }
  func.func @transform_2(%arg0: i32) -> (i32, i32, i32) {
    %c0_i32 = arith.constant 0 : i32
    %c0_i32_0 = arith.constant 0 : i32
    %c0_i32_1 = arith.constant 0 : i32
    %c0_i32_2 = arith.constant 0 : i32
    return %c0_i32, %c0_i32_0, %c0_i32_1 : i32, i32, i32
  }
}

</mosaic_0001>

<bundles_post_ra>
// kernel: tpu_custom_call.1
= control target key start
LH: loop header
LB: loop body
LE: loop exit
PB: predicated region body
PF: predicated region fallthrough
CT: control target
= control target key end

     0   :  { %7 = vsyncpa [#allocation3], 0  ;;  %s203_s0 = inlined_call_operand.hbm [shape: f32[16,128], index: 0, kind: input, shape index: {}]   ;;  %s204_s1 = inlined_call_operand.hbm [shape: f32[16,128], index: 1, kind: input, shape index: {}]   ;;  %s205_s2 = inlined_call_operand.hbm [shape: f32[2,8,128], index: 2, kind: output, shape index: {}]  }
   0x1   :  { %8 = vsyncpa [#allocation6], 0 }
   0x2   :  { %9 = vsyncpa [#allocation4], 0  ;;  %s165_s9 = smov [#allocation2]  }
   0x3   :  { %s15_s10 = sshll.u32 %s165_s9, 4  ;;  %s16_s10 = int_to_ptr.vmem [resolvable:$true] %s15_s10 }
   0x4   :  { %s107_s11 = scalar_lea.vmem %s16_s10, 256  ;;  %p112_p1 = scmp.lt.s32.totalorder %s16_s10, %s16_s10 }
   0x5   :  { %p108_p0 = scmp.ne.s32.totalorder %s16_s10, %s107_s11  ;;  %p113_p2 = scmp.lt.s32.totalorder %s107_s11, %s107_s11 }
   0x7   :  { %p114_p3 = por %p113_p2, %p112_p1 }
   0x9   :  { %p115_p4 = pnand %p114_p3, %p108_p0 }
   0xb   :  { %118 = shalt.err (!%p115_p4)
}
   0xc   :  { %s166_s12 = smov 128   ;;  %s167_s13 = smov 8  }
   0xd   :  { %21 = dma.hbm_to_vmem [thread:$0]  %s203_s0, 256, %s16_s10, [#allocation3], %s166_s12, %s166_s12, %s167_s13  }
   0xe   :  { %s168_s16 = smov [#allocation5]  }
   0xf   :  { %s27_s17 = sshll.u32 %s168_s16, 4  ;;  %s28_s17 = int_to_ptr.vmem [resolvable:$true] %s27_s17 }
  0x10   :  { %s127_s18 = scalar_lea.vmem %s28_s17, 256  ;;  %p132_p6 = scmp.lt.s32.totalorder %s28_s17, %s28_s17 }
  0x11   :  { %p128_p5 = scmp.ne.s32.totalorder %s28_s17, %s127_s18  ;;  %p133_p7 = scmp.lt.s32.totalorder %s127_s18, %s127_s18 }
  0x13   :  { %p134_p8 = por %p133_p7, %p132_p6 }
  0x15   :  { %p135_p9 = pnand %p134_p8, %p128_p5 }
  0x17   :  { %138 = shalt.err (!%p135_p9)
}
  0x18   :  { %33 = dma.hbm_to_vmem [thread:$0]  %s204_s1, 256, %s28_s17, [#allocation6], %s166_s12, %s166_s12, %s167_s13  }
  0x19   :  { %159 = dma.done.wait [#allocation3], 256  }
  0x1a   :  { %160 = vsyncadd [#allocation3], 4294967040 }
  0x1b   :  { %161 = dma.done.wait [#allocation6], 256  }
  0x1c   :  { %162 = vsyncadd [#allocation6], 4294967040  ;;  %v46_v0 = vld [vmem:[#allocation2] sm:$0xff]  ;;  %v47_v1 = vld [vmem:[#allocation2 + $0x8] sm:$0xff]  ;;  %s169_s0 = smov [#allocation7]  }
  0x1d   :  { %v50_v2 = vmul.f32 0.5, %v46_v0  ;;  %v51_v3 = vmul.f32 0.5, %v47_v1  ;;  %v48_v7 = vld [vmem:[#allocation5] sm:$0xff]  ;;  %v49_v9 = vld [vmem:[#allocation5 + $0x8] sm:$0xff]  ;;  %s76_s1 = sshll.u32 %s169_s0, 4  ;;  %s77_s1 = int_to_ptr.vmem [resolvable:$true] %s76_s1 }
  0x1e   :  { %s139_s21 = scalar_lea.vmem %s77_s1, 256  ;;  %p144_p11 = scmp.lt.s32.totalorder %s77_s1, %s77_s1 }
  0x1f   :  { %95 = vtanh.f32 %v50_v2  ;;  %p140_p10 = scmp.ne.s32.totalorder %s77_s1, %s139_s21  ;;  %p145_p12 = scmp.lt.s32.totalorder %s139_s21, %s139_s21 }
  0x20   :  { %97 = vtanh.f32 %v51_v3 }
  0x21   :  { %p146_p13 = por %p145_p12, %p144_p11 }
  0x23   :  { %p147_p0 = pnand %p146_p13, %p140_p10 }
  0x2c   :  { %v96_v4 = vpop.eup %95 }
  0x2d   :  { %v98_v5 = vpop.eup %97  ;;  %v54_v6 = vmul.f32 0.5, %v96_v4 }
  0x2e   :  { %v55_v8 = vmul.f32 0.5, %v98_v5 }
  0x2f   :  { %v56_v10 = vadd.f32 0.5, %v54_v6 }
  0x30   :  { %v57_v11 = vadd.f32 0.5, %v55_v8 }
  0x31   :  { %v58_v12 = vmul.f32 %v56_v10, %v48_v7  ;;  %v60_v13 = vadd.f32 %v56_v10, %v48_v7 }
  0x32   :  { %v59_v14 = vmul.f32 %v57_v11, %v49_v9  ;;  %v61_v15 = vadd.f32 %v57_v11, %v49_v9 }
  0x34   :  { %v63_v16 = vadd.f32 %v59_v14, %v58_v12  ;;  %v68_v17 = vadd.f32 %v61_v15, %v60_v13 }
  0x36   :  { %65 = vst [vmem:[#allocation7] sm:$0xff] %v63_v16  ;;  %70 = vst [vmem:[#allocation7 + $0x8] sm:$0xff] %v68_v17 }
  0x37   :  { %150 = shalt.err (!%p147_p0)
}
  0x38   :  { %82 = dma.vmem_to_hbm [thread:$0]  %s77_s1, 256, %s205_s2, [#allocation4], %s166_s12, %s166_s12, %s167_s13  }
  0x39   :  { %163 = dma.done.wait [#allocation4], 256  }
  0x3a   :  { %164 = vsyncadd [#allocation4], 4294967040 }
  0x3b   :  { %86 = vsyncpa [#allocation3], 1 }
  0x3c   :  { %87 = vsyncpa [#allocation6], 1 }
  0x3d   :  { %88 = vsyncpa [#allocation4], 1 }

</bundles_post_ra>
